<compile_context>
chip_gen: v6e
topology: v6e:2x2x1
jax: 0.10.0
libtpu: 0.0.40
codegen_flags: <defaults>
</compile_context>

<pallas_src>
import functools

import jax
import jax.numpy as jnp
from jax.experimental import pallas as pl
from jax.experimental.pallas import tpu as pltpu

_IN_FEATURES = 784
_N_CLASSES = 10
_N_PAD = 128          # lane-padded class dim used inside the kernel
_NEG_BIG = -1e30      # bias fill for padded class columns (masks them in softmax)


def _round_up(x, m):
    return (x + m - 1) // m * m


def _tm_cap():
    # v5e: keep 2 x (tm x 784 x 4B) input buffers under the 16 MiB scoped-VMEM
    # default -> tm=1024.  v6e/v7x (32 MiB scoped default): tm=2048.
    try:
        kind = jax.devices()[0].device_kind.lower()
    except Exception:
        kind = ""
    if "v5 lite" in kind or "v5e" in kind or "v5litepod" in kind:
        return 1024
    return 2048


def _pick_tm(n):
    if n <= 8:
        return n                                    # full-extent block, single step
    # Aim for >= 2 grid steps (megacore on v7x) with sublane-aligned (x8) tiles.
    return min(_tm_cap(), _round_up(pl.cdiv(n, 2), 8))


# -------------- Pallas kernel: fused linear + bias + log_softmax --------------

def _netlin_kernel(x_ref, w_ref, b_ref, o_ref, *, n_classes):
    # bf16 operands on the MXU, f32 accumulation: [tm, 784] @ [784, 128].
    x = x_ref[...].astype(jnp.bfloat16)
    logits = jnp.dot(x, w_ref[...], preferred_element_type=jnp.float32)
    # Bias add; padded class columns carry -1e30 so they vanish in the softmax.
    logits = logits + b_ref[...]
    # log_softmax over the class axis (row-wise, stays in vregs).
    m = jnp.max(logits, axis=-1, keepdims=True)
    s = logits - m
    lse = jnp.log(jnp.sum(jnp.exp(s), axis=-1, keepdims=True))
    y = s - lse
    # Store only the real 10 classes (full last dim of the output).
    o_ref[...] = y[:, :n_classes].astype(o_ref.dtype)


# ---------------------- Params & forward wrapper ----------------------

def init_params(key):
    kw, kb = jax.random.split(key)
    bound = 1.0 / jnp.sqrt(jnp.float32(_IN_FEATURES))
    return {
        # Stored as [in, out] (transpose of PyTorch's [out, in]) so the kernel
        # consumes it directly; same uniform(-1/sqrt(fan_in)) init as nn.Linear.
        "w": jax.random.uniform(kw, (_IN_FEATURES, _N_CLASSES), jnp.float32, -bound, bound),
        "b": jax.random.uniform(kb, (_N_CLASSES,), jnp.float32, -bound, bound),
    }


@jax.jit
def netlin_forward(params, x):
    n = x.shape[0]
    flat = x.reshape(n, -1)          # x.view(N, -1); native dtype, no extra HBM pass
    k = flat.shape[1]
    assert k == _IN_FEATURES

    tm = _pick_tm(n)
    grid_m = pl.cdiv(n, tm)          # last block clipped by Pallas; no jnp.pad of the batch

    # Lane-pad weights 10 -> 128 (bf16, zeros) and bias (f32, -1e30 in pad cols).
    w_pad = (jnp.zeros((k, _N_PAD), jnp.bfloat16)
             .at[:, :_N_CLASSES].set(params["w"].astype(jnp.bfloat16)))
    b_pad = (jnp.full((1, _N_PAD), _NEG_BIG, jnp.float32)
             .at[:, :_N_CLASSES].set(params["b"].astype(jnp.float32)))

    cost = pl.CostEstimate(
        flops=2 * n * k * _N_CLASSES,
        transcendentals=n * _N_PAD,
        bytes_accessed=(flat.size * flat.dtype.itemsize
                        + w_pad.size * 2 + b_pad.size * 4
                        + n * _N_CLASSES * 4),
    )

    out = pl.pallas_call(
        functools.partial(_netlin_kernel, n_classes=_N_CLASSES),
        out_shape=jax.ShapeDtypeStruct((n, _N_CLASSES), jnp.float32),
        grid=(grid_m,),
        in_specs=[
            pl.BlockSpec((tm, k), lambda i: (i, 0)),       # activations: streamed per tile
            pl.BlockSpec((k, _N_PAD), lambda i: (0, 0)),   # weights: VMEM-resident
            pl.BlockSpec((1, _N_PAD), lambda i: (0, 0)),   # bias: VMEM-resident
        ],
        out_specs=pl.BlockSpec((tm, _N_CLASSES), lambda i: (i, 0)),
        compiler_params=pltpu.CompilerParams(
            dimension_semantics=("parallel",),             # shard M across v7x's 2 TCs
        ),
        cost_estimate=cost,
    )(flat, w_pad, b_pad)
    return out


if __name__ == "__main__":
    key = jax.random.PRNGKey(0)
    pkey, xkey1, xkey2 = jax.random.split(key, 3)
    params = init_params(pkey)

    def ref_forward(p, x):
        xf = x.reshape(x.shape[0], -1).astype(jnp.float32)
        return jax.nn.log_softmax(xf @ p["w"] + p["b"], axis=-1)

    # Small MNIST-shaped input (input_size=784 -> [N, 1, 28, 28]), batch=2.
    x_small = jax.random.normal(xkey1, (2, 1, 28, 28), dtype=jnp.float32)
    out = netlin_forward(params, x_small)
    jax.block_until_ready(out)
    assert out.shape == (2, _N_CLASSES)
    # bf16 operands at the dot -> loosened tolerance (f32 accumulation).
    assert jnp.allclose(out, ref_forward(params, x_small), rtol=2e-2, atol=2e-2)
    assert jnp.allclose(jnp.exp(out).sum(axis=-1), 1.0, atol=1e-3)

    # A batch that does not divide the tile: exercises the Pallas-clipped last block.
    x_odd = jax.random.normal(xkey2, (19, 1, 28, 28), dtype=jnp.float32)
    out_odd = netlin_forward(params, x_odd)
    jax.block_until_ready(out_odd)
    assert out_odd.shape == (19, _N_CLASSES)
    assert jnp.allclose(out_odd, ref_forward(params, x_odd), rtol=2e-2, atol=2e-2)

    print("KERNEL_OK")
</pallas_src>

<mosaic_0001>
module attributes {stable_mosaic.version = 11 : i64} {
  func.func @_netlin_kernel(%arg0: i32, %arg1: memref<2x784xf32, #tpu.memory_space<vmem>>, %arg2: memref<784x128xbf16, #tpu.memory_space<vmem>>, %arg3: memref<1x128xf32, #tpu.memory_space<vmem>>, %arg4: memref<2x10xf32, #tpu.memory_space<vmem>>) attributes {dimension_semantics = [#tpu.dimension_semantics<parallel>], iteration_bounds = array<i64: 1>, scalar_prefetch = 0 : i64, scratch_operands = 0 : i64, tpu.core_type = #tpu.core_type<tc>, window_params = [{transform_indices = @transform_0, window_bounds = array<i64: 2, 784>}, {pipeline_mode = #tpu.pipeline_mode<synchronous>, transform_indices = @transform_1, window_bounds = array<i64: 784, 128>}, {pipeline_mode = #tpu.pipeline_mode<synchronous>, transform_indices = @transform_2, window_bounds = array<i64: 1, 128>}, {transform_indices = @transform_3, window_bounds = array<i64: 2, 10>}]} {
    %c0 = arith.constant 0 : index
    %c0_0 = arith.constant 0 : index
    %0 = vector.load %arg1[%c0, %c0_0] : memref<2x784xf32, #tpu.memory_space<vmem>>, vector<2x784xf32>
    %1 = arith.truncf %0 : vector<2x784xf32> to vector<2x784xbf16>
    %c0_1 = arith.constant 0 : index
    %c0_2 = arith.constant 0 : index
    %2 = vector.load %arg2[%c0_1, %c0_2] : memref<784x128xbf16, #tpu.memory_space<vmem>>, vector<784x128xbf16>
    %cst = arith.constant dense<0.000000e+00> : vector<2x128xf32>
    %3 = tpu.matmul %1, %2, %cst {dimension_numbers = #tpu.dot_dimension_numbers<[1], [0], [0], [1], [0, 0, 1, 1], [], []>} : vector<2x784xbf16>, vector<784x128xbf16>, vector<2x128xf32> -> vector<2x128xf32>
    %c0_3 = arith.constant 0 : index
    %c0_4 = arith.constant 0 : index
    %4 = vector.load %arg3[%c0_3, %c0_4] : memref<1x128xf32, #tpu.memory_space<vmem>>, vector<1x128xf32>
    %5 = vector.broadcast %4 : vector<1x128xf32> to vector<2x128xf32>
    %6 = arith.addf %3, %5 : vector<2x128xf32>
    %cst_5 = arith.constant dense<0xFF800000> : vector<2xf32>
    %7 = vector.multi_reduction <maximumf>, %6, %cst_5 [1] : vector<2x128xf32> to vector<2xf32>
    %8 = vector.shape_cast %7 : vector<2xf32> to vector<2x1xf32>
    %9 = vector.broadcast %8 : vector<2x1xf32> to vector<2x128xf32>
    %10 = arith.subf %6, %9 : vector<2x128xf32>
    %11 = math.exp %10 : vector<2x128xf32>
    %cst_6 = arith.constant dense<0.000000e+00> : vector<2xf32>
    %12 = vector.multi_reduction <add>, %11, %cst_6 [1] : vector<2x128xf32> to vector<2xf32>
    %13 = vector.shape_cast %12 : vector<2xf32> to vector<2x1xf32>
    %14 = math.log %13 : vector<2x1xf32>
    %15 = vector.broadcast %14 : vector<2x1xf32> to vector<2x128xf32>
    %16 = arith.subf %10, %15 : vector<2x128xf32>
    %17 = vector.extract_strided_slice %16 {offsets = [0, 0], sizes = [2, 10], strides = [1, 1]} : vector<2x128xf32> to vector<2x10xf32>
    %c0_7 = arith.constant 0 : index
    %c0_8 = arith.constant 0 : index
    %18 = vector.load %arg4[%c0_7, %c0_8] : memref<2x10xf32, #tpu.memory_space<vmem>>, vector<2x10xf32>
    tpu.vector_store %arg4[%c0_7, %c0_8], %17 {strides = array<i32>} : memref<2x10xf32, #tpu.memory_space<vmem>>, vector<2x10xf32>,
    return
  }
  func.func @transform_0(%arg0: i32) -> (i32, i32) {
    %c0_i32 = arith.constant 0 : i32
    %c0_i32_0 = arith.constant 0 : i32
    return %arg0, %c0_i32 : i32, i32
  }
  func.func @transform_1(%arg0: i32) -> (i32, i32) {
    %c0_i32 = arith.constant 0 : i32
    %c0_i32_0 = arith.constant 0 : i32
    %c0_i32_1 = arith.constant 0 : i32
    return %c0_i32, %c0_i32_0 : i32, i32
  }
  func.func @transform_2(%arg0: i32) -> (i32, i32) {
    %c0_i32 = arith.constant 0 : i32
    %c0_i32_0 = arith.constant 0 : i32
    %c0_i32_1 = arith.constant 0 : i32
    return %c0_i32, %c0_i32_0 : i32, i32
  }
  func.func @transform_3(%arg0: i32) -> (i32, i32) {
    %c0_i32 = arith.constant 0 : i32
    %c0_i32_0 = arith.constant 0 : i32
    return %arg0, %c0_i32 : i32, i32
  }
}

</mosaic_0001>

<bundles_post_ra>
// kernel: netlin_forward.1
= control target key start
LH: loop header
LB: loop body
LE: loop exit
PB: predicated region body
PF: predicated region fallthrough
CT: control target
= control target key end

     0   :  { %v24_v27 = vlaneseq  ;;  %v865_v35 = vmov 1983009808   ;;  %v866_v40 = vmov 0.0   ;;  %vm867_vm0 = vmmov 0   ;;  %s1048_s0 = inlined_call_operand.vmem [shape: f32[2,784], index: 0, kind: input, shape index: {}]   ;;  %s1049_s1 = inlined_call_operand.vmem [shape: bf16[784,128], index: 1, kind: input, shape index: {}]   ;;  %s1050_s2 = inlined_call_operand.vmem [shape: f32[1,128], index: 2, kind: input, shape index: {}]   ;;  %s1051_s3 = inlined_call_operand.hbm [shape: f32[2,10], index: 3, kind: output, shape index: {}]  }
   0x1   :  { %v788_v0 = vld [vmem:[%s1049_s1 + $0x78] sm:$0xff]   ;;  %v792_v4 = vld [vmem:[%s1049_s1 + $0x70] sm:$0xff]   ;;  %v796_v8 = vld [vmem:[%s1049_s1 + $0x68] sm:$0xff]   ;;  %v22_v36 = vunpack.c.l.s4 %v865_v35 }
   0x2   :  { %v789_v1 = vld [vmem:[%s1049_s1 + $0x38] sm:$0xff]   ;;  %710 = vmatprep.subr.bf16.mxu0 %v788_v0  ;;  %v793_v5 = vld [vmem:[%s1049_s1 + $0x30] sm:$0xff]   ;;  %v797_v9 = vld [vmem:[%s1049_s1 + $0x28] sm:$0xff]   ;;  %v25_v32 = vshrl.u32 %v24_v27, 7 }
   0x3   :  { %v790_v2 = vld [vmem:[%s1049_s1 + $0xf8] sm:$0xff]   ;;  %711 = vmatpush3.bf16.msra.mxu0 %v789_v1  ;;  %v794_v6 = vld [vmem:[%s1049_s1 + $0xf0] sm:$0xff]   ;;  %v798_v10 = vld [vmem:[%s1049_s1 + $0xe8] sm:$0xff]   ;;  %v23_v38 = vunpack.c.0.s8 %v22_v36 }
   0x4   :  { %v791_v3 = vld [vmem:[%s1049_s1 + $0xb8] sm:$0xff]   ;;  %732 = vmatprep.subr.bf16.mxu1 %v790_v2  ;;  %712 = vmatprep.subr.bf16.mxu0 %v792_v4  ;;  %v795_v7 = vld [vmem:[%s1049_s1 + $0xb0] sm:$0xff]   ;;  %v799_v11 = vld [vmem:[%s1049_s1 + $0xa8] sm:$0xff]  }
   0x5   :  { %733 = vmatpush3.bf16.msra.mxu1 %v791_v3  ;;  %v800_v12 = vld [vmem:[%s1049_s1 + $0x60] sm:$0xff]   ;;  %v804_v16 = vld [vmem:[%s1049_s1 + $0x58] sm:$0xff]   ;;  %v808_v20 = vld [vmem:[%s1049_s1 + $0x50] sm:$0xff]   ;;  %v26_v41 = vsub.s32 %v23_v38, %v25_v32 }
   0x6   :  { %734 = vmatprep.subr.bf16.mxu1 %v794_v6  ;;  %v801_v13 = vld [vmem:[%s1049_s1 + $0x20] sm:$0xff]   ;;  %v805_v17 = vld [vmem:[%s1049_s1 + $0x18] sm:$0xff]   ;;  %v809_v21 = vld [vmem:[%s1049_s1 + $0x10] sm:$0xff]  }
   0x7   :  { %713 = vmatpush3.bf16.msra.mxu0 %v793_v5  ;;  %v802_v14 = vld [vmem:[%s1049_s1 + $0xe0] sm:$0xff]   ;;  %v806_v18 = vld [vmem:[%s1049_s1 + $0xd8] sm:$0xff]   ;;  %v810_v22 = vld [vmem:[%s1049_s1 + $0xd0] sm:$0xff]  }
   0x8   :  { %714 = vmatprep.subr.bf16.mxu0 %v796_v8  ;;  %v803_v15 = vld [vmem:[%s1049_s1 + $0xa0] sm:$0xff]   ;;  %v807_v19 = vld [vmem:[%s1049_s1 + $0x98] sm:$0xff]   ;;  %v811_v23 = vld [vmem:[%s1049_s1 + $0x90] sm:$0xff]  }
   0x9   :  { %735 = vmatpush3.bf16.msra.mxu1 %v795_v7  ;;  %v812_v24 = vld [vmem:[%s1049_s1 + $0x48] sm:$0xff]   ;;  %v816_v29 = vld [vmem:[%s1049_s1 + $0x40] sm:$0xff]   ;;  %v820_v37 = vld [vmem:[%s1049_s1 + $0x178] sm:$0xff]  }
   0xa   :  { %736 = vmatprep.subr.bf16.mxu1 %v798_v10  ;;  %v813_v25 = vld [vmem:[%s1049_s1 + $0x8] sm:$0xff]   ;;  %v817_v30 = vld [vmem:[%s1049_s1] sm:$0xff]   ;;  %v822_v50 = vld [vmem:[%s1049_s1 + $0x138] sm:$0xff]  }
   0xb   :  { %715 = vmatpush3.bf16.msra.mxu0 %v797_v9  ;;  %v814_v26 = vld [vmem:[%s1049_s1 + $0xc8] sm:$0xff]   ;;  %v818_v31 = vld [vmem:[%s1049_s1 + $0xc0] sm:$0xff]   ;;  %v823_v51 = vld [vmem:[%s1049_s1 + $0x170] sm:$0xff]  }
   0xc   :  { %716 = vmatprep.subr.bf16.mxu0 %v800_v12  ;;  %v815_v28 = vld [vmem:[%s1049_s1 + $0x88] sm:$0xff]   ;;  %v16_v33 = vld [vmem:[%s1048_s0] sm:$0xff]  ;;  %v824_v52 = vld [vmem:[%s1049_s1 + $0x130] sm:$0xff]  }
   0xd   :  { %737 = vmatpush3.bf16.msra.mxu1 %v799_v11  ;;  %v819_v34 = vld [vmem:[%s1049_s1 + $0x80] sm:$0xff]   ;;  %v20_v39 = vcombine.high %v16_v33, %v16_v33  ;;  %v27_v42 = vrot.slane %v16_v33, %v26_v41  ;;  %v825_v53 = vld [vmem:[%s1049_s1 + $0x168] sm:$0xff]  }
   0xe   :  { %738 = vmatprep.subr.bf16.mxu1 %v802_v14  ;;  %v837_v54 = vld [vmem:[%s1049_s1 + $0x180] sm:$0xff]   ;;  %v17_v55 = vld [vmem:[%s1048_s0 + $0x8] sm:$0x3f] }
   0xf   :  { %717 = vmatpush3.bf16.msra.mxu0 %v801_v13  ;;  %v34_v43 = vrot.slane %v20_v39, %v26_v41  ;;  %v35_v44 = vcombine.high %v27_v42, %v27_v42  ;;  %v60_v46 = vpack.c.bf16 %v27_v42, %v27_v42 }
  0x10   :  { %718 = vmatprep.subr.bf16.mxu0 %v804_v16 }
  0x11   :  { %739 = vmatpush3.bf16.msra.mxu1 %v803_v15  ;;  %v36_v45 = vcombine.high %v34_v43, %v34_v43  ;;  %v62_v47 = vpack.c.bf16 %v34_v43, %v34_v43  ;;  %v61_v48 = vpack.c.bf16 %v35_v44, %v35_v44 }
  0x12   :  { %740 = vmatprep.subr.bf16.mxu1 %v806_v18 }
  0x13   :  { %719 = vmatpush3.bf16.msra.mxu0 %v805_v17  ;;  %v63_v49 = vpack.c.bf16 %v36_v45, %v36_v45  ;;  %502 = vmatprep.mubr.bf16.mxu0 %v61_v48 }
  0x14   :  { %720 = vmatprep.subr.bf16.mxu0 %v808_v20 }
  0x15   :  { %741 = vmatpush3.bf16.msra.mxu1 %v807_v19  ;;  %542 = vmatprep.mubr.bf16.mxu1 %v63_v49 }
  0x16   :  { %742 = vmatprep.subr.bf16.mxu1 %v810_v22 }
  0x17   :  { %721 = vmatpush3.bf16.msra.mxu0 %v809_v21 }
  0x18   :  { %722 = vmatprep.subr.bf16.mxu0 %v812_v24 }
  0x19   :  { %743 = vmatpush3.bf16.msra.mxu1 %v811_v23 }
  0x1a   :  { %744 = vmatprep.subr.bf16.mxu1 %v814_v26 }
  0x1b   :  { %723 = vmatpush3.bf16.msra.mxu0 %v813_v25 }
  0x1c   :  { %724 = vmatprep.subr.bf16.mxu0 %v816_v29 }
  0x1d   :  { %745 = vmatpush3.bf16.msra.mxu1 %v815_v28 }
  0x1e   :  { %746 = vmatprep.subr.bf16.mxu1 %v818_v31 }
  0x1f   :  { %725 = vmatpush3.bf16.msra.mxu0 %v817_v30 }
  0x20   :  { %754 = vmatprep.subr.bf16.mxu0 %v820_v37 }
  0x21   :  { %747 = vmatpush3.bf16.msra.mxu1 %v819_v34 }
  0x22   :  { %778 = vmatprep.subr.bf16.mxu1 %v866_v40  ;;  %503 = vmatmul.mubr.bf16.vlgmr.msra.gmra.mxu0 %v60_v46 }
  0x23   :  { %755 = vmatpush3.bf16.msra.mxu0 %v822_v50 }
  0x24   :  { %543 = vmatmul.mubr.bf16.vlgmr.msra.gmra.mxu1 %v62_v47  ;;  %756 = vmatprep.subr.bf16.mxu0 %v823_v51 }
  0x25   :  { %780 = vmatprep.mubr.msk.bf16.mxu1 %vm867_vm0, %v866_v40 }
  0x26   :  { %8 = vsyncpa [#allocation3], 0  ;;  %v826_v56 = vld [vmem:[%s1049_s1 + $0x128] sm:$0xff]   ;;  %v37_v57 = vcombine.high %v17_v55, %v17_v55  ;;  %v44_v58 = vrot.slane %v17_v55, %v26_v41  ;;  %v827_v59 = vld [vmem:[%s1049_s1 + $0x160] sm:$0xff]   ;;  %779 = vmatpush3.bf16.msra.mxu1 %v837_v54  ;;  %vm466_vm1 = vcmask 130048   ;;  %vm630_vm2 = vcmask 1041408  }
  0x27   :  { %757 = vmatpush3.bf16.msra.mxu0 %v824_v52  ;;  %v828_v62 = vld [vmem:[%s1049_s1 + $0x120] sm:$0xff]   ;;  %v829_v1 = vld [vmem:[%s1049_s1 + $0x158] sm:$0xff]   ;;  %v831_v3 = vld [vmem:[%s1049_s1 + $0x150] sm:$0xff]   ;;  %vm643_vm3 = vcmask 74752  }
  0x28   :  { %758 = vmatprep.subr.bf16.mxu0 %v825_v53  ;;  %v51_v60 = vrot.slane %v37_v57, %v26_v41  ;;  %v52_v61 = vcombine.high %v44_v58, %v44_v58  ;;  %v830_v2 = vld [vmem:[%s1049_s1 + $0x118] sm:$0xff]   ;;  %v832_v4 = vld [vmem:[%s1049_s1 + $0x110] sm:$0xff]   ;;  %v833_v5 = vld [vmem:[%s1049_s1 + $0x148] sm:$0xff]   ;;  %v64_v9 = vpack.c.bf16 %v44_v58, %v44_v58 }
  0x29   :  { %v834_v6 = vld [vmem:[%s1049_s1 + $0x108] sm:$0xff]   ;;  %v835_v7 = vld [vmem:[%s1049_s1 + $0x140] sm:$0xff]  }
  0x2a   :  { %v65_v63 = vpack.c.bf16 %v52_v61, %v52_v61  ;;  %v66_v0 = vpack.c.bf16 %v51_v60, %v51_v60  ;;  %v836_v8 = vld [vmem:[%s1049_s1 + $0x100] sm:$0xff]   ;;  %s868_s1 = smov [#allocation2]  }
  0x2b   :  { %759 = vmatpush3.bf16.msra.mxu0 %v826_v56  ;;  %v659_v23 = vld [vmem:[%s1050_s2] ss:$0 sm:$0xff]  ;;  %s651_s2 = sshll.u32 %s868_s1, 4  ;;  %s652_s2 = int_to_ptr.vmem [resolvable:$true] %s651_s2 }
  0x2c   :  { %760 = vmatprep.subr.bf16.mxu0 %v827_v59  ;;  %582 = vmatprep.mubr.bf16.mxu0 %v65_v63  ;;  %s843_s7 = scalar_lea.vmem %s652_s2, 32  ;;  %p848_p1 = scmp.lt.s32.totalorder %s652_s2, %s652_s2 }
  0x2d   :  { %781 = vmatmul.mubr.msk.bf16.vlgmr.msra.gmra.mxu1 %vm466_vm1, %v66_v0  ;;  %p844_p0 = scmp.ne.s32.totalorder %s652_s2, %s843_s7  ;;  %p849_p2 = scmp.lt.s32.totalorder %s843_s7, %s843_s7 }
  0x2f   :  { %761 = vmatpush3.bf16.msra.mxu0 %v828_v62  ;;  %p850_p3 = por %p849_p2, %p848_p1 }
  0x30   :  { %762 = vmatprep.subr.bf16.mxu0 %v829_v1 }
  0x31   :  { %p851_p4 = pnand %p850_p3, %p844_p0 }
  0x33   :  { %763 = vmatpush3.bf16.msra.mxu0 %v830_v2 }
  0x34   :  { %764 = vmatprep.subr.bf16.mxu0 %v831_v3 }
  0x37   :  { %765 = vmatpush3.bf16.msra.mxu0 %v832_v4 }
  0x38   :  { %766 = vmatprep.subr.bf16.mxu0 %v833_v5 }
  0x3b   :  { %767 = vmatpush3.bf16.msra.mxu0 %v834_v6 }
  0x3c   :  { %768 = vmatprep.subr.bf16.mxu0 %v835_v7 }
  0x3f   :  { %769 = vmatpush3.bf16.msra.mxu0 %v836_v8 }
  0x42   :  { %583 = vmatmul.mubr.bf16.vlgmr.msra.gmra.mxu0 %v64_v9 }
  0xe2   :  { %v726_v10 = vpop.f32.mrf.mxu0 }
  0xe4   :  { %v748_v11 = vpop.f32.mrf.mxu1  ;;  %v727_v12 = vpop.f32.mrf.mxu0 }
  0xe5   :  { %v728_v22 = vadd.f32 %v727_v12, %v726_v10 }
  0xe6   :  { %v749_v13 = vpop.f32.mrf.mxu1  ;;  %v729_v14 = vpop.f32.mrf.mxu0 }
  0xe7   :  { %v505_v24 = vadd.f32 %v728_v22, %v659_v23  ;;  %v750_v25 = vadd.f32 %v749_v13, %v748_v11 }
  0xe8   :  { %v751_v15 = vpop.f32.mrf.mxu1  ;;  %v730_v16 = vpop.f32.mrf.mxu0 }
  0xe9   :  { %v545_v28 = vadd.f32 %v750_v25, %v505_v24 }
  0xea   :  { %v752_v17 = vpop.f32.mrf.mxu1 }
  0xed   :  { %v624_v18 = vpop.f32.mrf.mxu1 }
  0xef   :  { %v782_v19 = vpop.f32.mrf.mxu1 }
  0xf1   :  { %v627_v20 = vpop.f32.mrf.mxu1 }
  0xf3   :  { %v783_v21 = vpop.f32.mrf.mxu1 }
 0x102   :  { %v770_v26 = vpop.f32.mrf.mxu0 }
 0x104   :  { %v771_v27 = vpop.f32.mrf.mxu0 }
 0x105   :  { %v772_v29 = vadd.f32 %v771_v27, %v770_v26 }
 0x106   :  { %v773_v30 = vpop.f32.mrf.mxu0 }
 0x107   :  { %v585_v31 = vadd.f32 %v772_v29, %v545_v28 }
 0x108   :  { %v774_v32 = vpop.f32.mrf.mxu0 }
 0x109   :  { %v625_v33 = vadd.f32 %v624_v18, %v585_v31 }
 0x10b   :  { %v631_v34 = vsel %vm630_vm2, %v625_v33, -inf }
 0x10c   :  { %632 = vmax.xlane.f32.xlu0 %v631_v34 }
 0x195   :  { %v633_v35 = vpop.xlane.xlu0 %632 }
 0x196   :  { %v634_v36 = vsub.f32 %v625_v33, %v633_v35 }
 0x198   :  { %v635_v37 = vmul.f32 1.442695, %v634_v36 }
 0x19a   :  { %839 = vpow2.f32 %v635_v37 }
 0x1a7   :  { %v840_v38 = vpop.eup %839 }
 0x1a8   :  { %v637_v39 = vsel %vm630_vm2, %v840_v38, 0.0 }
 0x1a9   :  { %638 = vadd.xlane.f32.xlu0 %v637_v39 }
 0x232   :  { %v639_v40 = vpop.xlane.xlu0 %638 }
 0x233   :  { %841 = vlog2.f32 %v639_v40 }
 0x240   :  { %v842_v41 = vpop.eup %841 }
 0x241   :  { %v641_v42 = vmul.f32 0.6931472, %v842_v41 }
 0x243   :  { %v642_v43 = vsub.f32 %v634_v36, %v641_v42 }
 0x245   :  { %644 = vst.msk [vmem:[#allocation2] sm:$0x3] %vm643_vm3, %v642_v43 }
 0x246   :  { %854 = shalt.err (!%p851_p4)
}
 0x247   :  { %654 = dma.vmem_to_hbm [thread:$0]  %s652_s2, 32, %s1051_s3, [#allocation3]  }
 0x248   :  { %863 = dma.done.wait [#allocation3], 32  }
 0x249   :  { %864 = vsyncadd [#allocation3], 4294967264 }
 0x24a   :  { %658 = vsyncpa [#allocation3], 1 }

</bundles_post_ra>
